<compile_context>
chip_gen: v5e
topology: v5e:2x2
jax: 0.10.0
libtpu: 0.0.40
codegen_flags: <defaults>
</compile_context>

<pallas_src>
import numpy as np
import jax
import jax.numpy as jnp
from jax.experimental import pallas as pl
from jax.experimental.pallas import tpu as pltpu


# --------------------------------------------------------------------------------------
# helpers
# --------------------------------------------------------------------------------------
def _ceil_to(x, m):
    return ((x + m - 1) // m) * m


def _pad2(a, rows, cols, value=0.0):
    r, c = a.shape
    return jnp.pad(a, ((0, rows - r), (0, cols - c)), constant_values=value)


def _bilinear_matrix(n_out, n_in):
    """Interpolation matrix (n_out, n_in) for bilinear resize, align_corners=False."""
    A = np.zeros((n_out, n_in), np.float32)
    if n_in == 1:
        A[:, 0] = 1.0
        return A
    src = (np.arange(n_out, dtype=np.float64) + 0.5) * (n_in / n_out) - 0.5
    i0 = np.floor(src).astype(np.int64)
    w = (src - i0).astype(np.float32)
    i0c = np.clip(i0, 0, n_in - 1)
    i1c = np.clip(i0 + 1, 0, n_in - 1)
    A[np.arange(n_out), i0c] += (1.0 - w)
    A[np.arange(n_out), i1c] += w
    return A


# --------------------------------------------------------------------------------------
# Kernel 1: fused  text_hidden_fcs (Linear->ReLU->Linear->Dropout(0.0)) + hypernet proj
#           applied only to the gathered [SEG]-token hidden states.
# grid = (hidden_tiles,): per step  h_j = ReLU(x @ w1[:, j] + b1[j]);
#   acc(m, out) += h_j @ w2[j, :]   (small f32 scratch, both matmuls overlap per step);
# last step: hyper = (acc + b2) @ hyper_w, emitted in bf16.
# --------------------------------------------------------------------------------------
def _seg_mlp_hyper_kernel(x_ref, w1_ref, b1_ref, w2_ref, b2_ref, hw_ref,
                          o_ref, acc_ref):
    @pl.when(pl.program_id(0) == 0)
    def _():
        acc_ref[...] = jnp.zeros_like(acc_ref)

    h = jnp.maximum(
        jnp.dot(x_ref[...], w1_ref[...], preferred_element_type=jnp.float32)
        + b1_ref[...], 0.0)                                        # ReLU(inplace)
    acc_ref[...] += jnp.dot(h.astype(jnp.bfloat16), w2_ref[...],
                            preferred_element_type=jnp.float32)

    @pl.when(pl.program_id(0) == pl.num_programs(0) - 1)
    def _():
        pe = acc_ref[...] + b2_ref[...]                            # Dropout(0.0) == identity
        o_ref[...] = jnp.dot(pe.astype(jnp.bfloat16), hw_ref[...],
                             preferred_element_type=jnp.float32).astype(o_ref.dtype)


def seg_mlp_hyper_pallas(x, w1, b1, w2, b2, hyper_w, *, hid_tile=512):
    M, in_dim = x.shape
    out_dim = w2.shape[1]
    C = hyper_w.shape[1]

    in_pad = _ceil_to(in_dim, 128)
    thid = min(hid_tile, in_pad)
    hid_pad = _ceil_to(in_pad, thid)
    out_pad = _ceil_to(out_dim, 128)
    c_pad = _ceil_to(C, 128)
    m_pad = _ceil_to(max(M, 1), 8)

    x_p = _pad2(x, m_pad, in_pad).astype(jnp.bfloat16)
    w1_p = _pad2(w1, in_pad, hid_pad).astype(jnp.bfloat16)
    b1_p = _pad2(jnp.asarray(b1, jnp.float32).reshape(1, -1), 1, hid_pad)
    w2_p = _pad2(w2, hid_pad, out_pad).astype(jnp.bfloat16)
    b2_p = _pad2(jnp.asarray(b2, jnp.float32).reshape(1, -1), 1, out_pad)
    hw_p = _pad2(hyper_w, out_pad, c_pad).astype(jnp.bfloat16)

    out = pl.pallas_call(
        _seg_mlp_hyper_kernel,
        out_shape=jax.ShapeDtypeStruct((m_pad, c_pad), jnp.bfloat16),
        grid=(hid_pad // thid,),
        in_specs=[
            pl.BlockSpec((m_pad, in_pad), lambda j: (0, 0)),
            pl.BlockSpec((in_pad, thid), lambda j: (0, j)),
            pl.BlockSpec((1, thid), lambda j: (0, j)),
            pl.BlockSpec((thid, out_pad), lambda j: (j, 0)),
            pl.BlockSpec((1, out_pad), lambda j: (0, 0)),
            pl.BlockSpec((out_pad, c_pad), lambda j: (0, 0)),
        ],
        out_specs=pl.BlockSpec((m_pad, c_pad), lambda j: (0, 0)),
        scratch_shapes=[pltpu.VMEM((m_pad, out_pad), jnp.float32)],
        compiler_params=pltpu.CompilerParams(
            dimension_semantics=("arbitrary",)),
    )(x_p, w1_p, b1_p, w2_p, b2_p, hw_p)
    return out                                                     # (m_pad, c_pad) bf16


# --------------------------------------------------------------------------------------
# Kernel 2: simplified SAM mask head — per image, tiled over the flattened HW axis
#           (hw_tile=2048 default: DMA-bound kernel, big lane-dense tiles).
# TODO(synk): the full SAM prompt encoder + two-way-transformer mask decoder is not
# implemented; only its final hypernetwork-matmul mask generation hot path is.
# --------------------------------------------------------------------------------------
def _mask_decode_kernel(hyper_ref, img_ref, o_ref):
    o_ref[...] = jnp.dot(hyper_ref[...], img_ref[...],
                         preferred_element_type=jnp.float32).astype(o_ref.dtype)


def mask_decode_pallas(hyper, img_flat, *, hw_tile=2048):
    B, n_pad, c_pad = hyper.shape                  # hyper already bf16, lane-padded
    _, C, HW = img_flat.shape
    hw_pad = _ceil_to(HW, 128)
    thw = min(hw_tile, hw_pad)
    hw_pad = _ceil_to(hw_pad, thw)
    img_p = jnp.pad(img_flat, ((0, 0), (0, c_pad - C), (0, hw_pad - HW))
                    ).astype(jnp.bfloat16)
    out = pl.pallas_call(
        _mask_decode_kernel,
        out_shape=jax.ShapeDtypeStruct((B, n_pad, hw_pad), jnp.float32),
        grid=(B, hw_pad // thw),
        in_specs=[
            pl.BlockSpec((None, n_pad, c_pad), lambda b, j: (b, 0, 0)),
            pl.BlockSpec((None, c_pad, thw), lambda b, j: (b, 0, j)),
        ],
        out_specs=pl.BlockSpec((None, n_pad, thw), lambda b, j: (b, 0, j)),
        compiler_params=pltpu.CompilerParams(
            dimension_semantics=("parallel", "parallel")),
    )(hyper, img_p)
    return out[:, :, :HW]


# --------------------------------------------------------------------------------------
# Kernel 3: fused bilinear-upsample + per-mask loss reduction terms.
#   pred_tile = A_h[tile] @ low_res @ A_w^T   (bilinear resize as two small matmuls)
#   bce_sum_n  = sum_{h,w} BCEWithLogits(pred, gt)
#   dice_num_n = 2 * sum_{h,w} (sigmoid(pred)/1000 * gt)
#   dice_den_n = sum_{h,w} sigmoid(pred)/1000 + gt/1000
# grid = (mask, row_tile); outputs stay resident across the row-reduction axis.
# Padding region handled in-kernel: logits forced to -1e4 (targets padded with 0).
# TODO(synk): SAM postprocess_masks (resize->crop->resize) approximated by one bilinear
# resize, expressed as the two interpolation matmuls fused into this loss kernel.
# --------------------------------------------------------------------------------------
def _make_upsample_loss_kernel(Hg, Wg, TH, WP):
    def kernel(low_ref, ah_ref, awt_ref, gt_ref, bce_ref, num_ref, den_ref):
        h = pl.program_id(1)

        @pl.when(h == 0)
        def _():
            bce_ref[...] = jnp.zeros_like(bce_ref)
            num_ref[...] = jnp.zeros_like(num_ref)
            den_ref[...] = jnp.zeros_like(den_ref)

        # bilinear upsample of this row tile: (TH, Hm) @ (Hm, Wm) @ (Wm, WP)
        rows = jnp.dot(ah_ref[...], low_ref[...], preferred_element_type=jnp.float32)
        pred = jnp.dot(rows, awt_ref[...], preferred_element_type=jnp.float32)

        # validity mask for row/col padding: padded logits -> -1e4, padded targets are 0
        r = jax.lax.broadcasted_iota(jnp.int32, (TH, WP), 0) + h * TH
        c = jax.lax.broadcasted_iota(jnp.int32, (TH, WP), 1)
        valid = jnp.logical_and(r < Hg, c < Wg)
        x = jnp.where(valid, pred, jnp.float32(-1e4))
        t = gt_ref[...].astype(jnp.float32)

        e = jnp.exp(-jnp.abs(x))                           # shared exp
        softplus = jnp.log(1.0 + e)                        # log(1 + exp(-|x|))
        inv = pl.reciprocal(1.0 + e, approx=False)         # exact (EUP has slack)
        p = jnp.where(x >= 0.0, inv, e * inv)              # sigmoid(x)
        bce = jnp.maximum(x, 0.0) - x * t + softplus
        scale = jnp.float32(1.0 / 1000.0)

        bce_ref[...] += jnp.sum(bce)
        num_ref[...] += 2.0 * jnp.sum(p * t) * scale
        den_ref[...] += (jnp.sum(p) + jnp.sum(t)) * scale
    return kernel


def upsample_loss_pallas(low_res, gt, Hg, Wg, *, row_tile=512):
    """low_res: (N, Hm, Wm) f32 low-resolution logits; gt: (N, Hg, Wg) targets."""
    N, Hm, Wm = low_res.shape
    TH = min(row_tile, _ceil_to(Hg, 8))
    Hg_pad = _ceil_to(Hg, TH)
    WP = _ceil_to(Wg, 128)

    ah = jnp.asarray(np.pad(_bilinear_matrix(Hg, Hm), ((0, Hg_pad - Hg), (0, 0))))
    awt = jnp.asarray(np.pad(_bilinear_matrix(Wg, Wm).T, ((0, 0), (0, WP - Wg))))
    gt_p = jnp.pad(gt.astype(jnp.bfloat16), ((0, 0), (0, Hg_pad - Hg), (0, WP - Wg)))
    low = low_res.astype(jnp.float32)

    out_sd = jax.ShapeDtypeStruct((N, 8, 128), jnp.float32)
    out_spec = pl.BlockSpec((None, 8, 128), lambda n, h: (n, 0, 0))
    kern = _make_upsample_loss_kernel(int(Hg), int(Wg), int(TH), int(WP))
    bce, num, den = pl.pallas_call(
        kern,
        out_shape=(out_sd, out_sd, out_sd),
        grid=(N, Hg_pad // TH),
        in_specs=[
            pl.BlockSpec((None, Hm, Wm), lambda n, h: (n, 0, 0)),
            pl.BlockSpec((TH, Hm), lambda n, h: (h, 0)),
            pl.BlockSpec((Wm, WP), lambda n, h: (0, 0)),
            pl.BlockSpec((None, TH, WP), lambda n, h: (n, h, 0)),
        ],
        out_specs=(out_spec, out_spec, out_spec),
        compiler_params=pltpu.CompilerParams(
            dimension_semantics=("parallel", "arbitrary"),
            vmem_limit_bytes=48 * 1024 * 1024),
    )(low, ah, awt, gt_p)
    return bce[:, 0, 0], num[:, 0, 0], den[:, 0, 0]


# --------------------------------------------------------------------------------------
# Forward pass (mirrors VlmSamSegForCausalLM.model_forward, inference=False)
# --------------------------------------------------------------------------------------
def vlm_sam_seg_forward(params, image_embeddings, vlm_last_hidden, vlm_ce_loss,
                        input_ids, offset, masks_list, *,
                        seg_token_idx, ce_loss_weight, dice_loss_weight, bce_loss_weight):
    # TODO(synk): Qwen2_5_VLForConditionalGeneration.forward, AutoProcessor and the SAM
    # ViT-H image encoder have no clean Pallas equivalent; their outputs
    # (vlm_last_hidden, vlm_ce_loss, image_embeddings) are taken as precomputed inputs.
    B_img, C, Hm, Wm = image_embeddings.shape
    n_seq, S = vlm_last_hidden.shape[:2]
    hid = vlm_last_hidden.shape[-1]
    assert B_img == len(offset) - 1, "Mismatch between images and offset"

    # --- host-side [SEG]-token bookkeeping (depends only on input_ids / offset) ---
    input_ids_np = np.asarray(input_ids)
    offset_np = np.asarray(offset)
    seg_token_mask = input_ids_np == seg_token_idx
    seq_idx, tok_idx = np.nonzero(seg_token_mask)          # row-major == sequence order
    total_seg = int(seq_idx.shape[0])
    seg_counts = seg_token_mask.sum(-1)
    seg_cum = np.concatenate([[0], np.cumsum(seg_counts)])
    seg_off = seg_cum[offset_np]
    n_per_image = [int(seg_off[i + 1] - seg_off[i]) for i in range(B_img)]
    max_n = max(n_per_image + [1])
    max_n_pad = _ceil_to(max_n, 8)

    img_of = np.zeros((total_seg,), np.int32)
    loc_of = np.zeros((total_seg,), np.int32)
    for i in range(B_img):
        s, e = int(seg_off[i]), int(seg_off[i + 1])
        img_of[s:e] = i
        loc_of[s:e] = np.arange(e - s)

    # --- 1) gather raw seg-token hidden states BEFORE the text MLP (exact: MLP is
    #        per-token) — FLOPs/HBM traffic shrink from n_seq*S rows to total_seg rows ---
    flat_idx = jnp.asarray(seq_idx * S + tok_idx, jnp.int32)
    seg_hidden = vlm_last_hidden.reshape(n_seq * S, hid)[flat_idx]    # (total_seg, hid)

    # --- 2) fused text_hidden_fcs + hypernetwork projection (one Pallas kernel) ---
    hyper_flat = seg_mlp_hyper_pallas(seg_hidden, params["w1"], params["b1"],
                                      params["w2"], params["b2"], params["hyper_w"])
    c_pad = hyper_flat.shape[1]

    # --- 3) one scatter into per-image (B, max_n_pad, c_pad) layout ---
    hyper_stack = jnp.zeros((B_img, max_n_pad, c_pad), jnp.bfloat16)
    if total_seg > 0:
        hyper_stack = hyper_stack.at[jnp.asarray(img_of), jnp.asarray(loc_of)].set(
            hyper_flat[:total_seg])

    # --- 4) mask decode (Pallas, tiled over HW) ---
    img_flat = image_embeddings.reshape(B_img, C, Hm * Wm)
    low_res = mask_decode_pallas(hyper_stack, img_flat)               # (B, n_pad, Hm*Wm)
    low_res = low_res.reshape(B_img, max_n_pad, Hm, Wm)

    # --- 5) losses ---
    ce_loss = vlm_ce_loss * ce_loss_weight

    # fused upsample+loss kernel: one call per gt-mask resolution group
    groups = {}
    for i in range(B_img):
        key_hw = tuple(int(d) for d in masks_list[i].shape[-2:])
        groups.setdefault(key_hw, []).append(i)

    per_image_terms = {}
    low_flat = low_res.reshape(B_img * max_n_pad, Hm, Wm)
    for (Hg, Wg), idxs in groups.items():
        sel = np.concatenate(
            [i * max_n_pad + np.arange(n_per_image[i]) for i in idxs]).astype(np.int32)
        low_g = low_flat[jnp.asarray(sel)]                            # (N_group, Hm, Wm)
        gt_g = jnp.concatenate([masks_list[i].astype(jnp.float32) for i in idxs], axis=0)
        bce_s, d_num, d_den = upsample_loss_pallas(low_g, gt_g, Hg, Wg)
        off2 = 0
        for i in idxs:
            n_i = n_per_image[i]
            per_image_terms[i] = (bce_s[off2:off2 + n_i], d_num[off2:off2 + n_i],
                                  d_den[off2:off2 + n_i], Hg, Wg)
            off2 += n_i

    mask_bce_loss = jnp.float32(0.0)
    mask_dice_loss = jnp.float32(0.0)
    num_masks = 0
    eps = 1e-6
    for i in range(B_img):
        gt_mask = masks_list[i]
        n_m = int(gt_mask.shape[0])
        assert n_m == n_per_image[i], "gt-mask / seg-token count mismatch"
        bce_s, d_num, d_den, Hg, Wg = per_image_terms[i]
        # sigmoid_ce_loss(pred, gt, n_m)
        bce_i = jnp.sum(bce_s) / float(Hg * Wg) / (float(n_m) + 1e-8)
        # dice_loss(pred, gt, n_m)
        dice_i = jnp.sum(1.0 - (d_num + eps) / (d_den + eps)) / (float(n_m) + 1e-8)
        mask_bce_loss = mask_bce_loss + bce_i * n_m
        mask_dice_loss = mask_dice_loss + dice_i * n_m
        num_masks += n_m
    mask_bce_loss = bce_loss_weight * mask_bce_loss / (num_masks + 1e-8)
    mask_dice_loss = dice_loss_weight * mask_dice_loss / (num_masks + 1e-8)
    mask_loss = mask_bce_loss + mask_dice_loss
    total_loss = ce_loss + mask_loss
    return {"loss": total_loss, "ce_loss": ce_loss, "mask_bce_loss": mask_bce_loss,
            "mask_dice_loss": mask_dice_loss, "mask_loss": mask_loss}


if __name__ == "__main__":
    key = jax.random.PRNGKey(0)
    in_dim, out_dim = 128, 128        # config.hidden_size, kwargs['out_dim']
    C, Hm, Wm = 128, 16, 16           # image-embedding channels / spatial
    Hg, Wg = 32, 32                   # original (gt) mask size
    n_seq, S = 2, 8                   # sequences, sequence length
    B_img = 2                         # images
    seg_token_idx = 7

    ks = jax.random.split(key, 8)
    params = {
        "w1": 0.05 * jax.random.normal(ks[0], (in_dim, in_dim), jnp.float32),
        "b1": jnp.zeros((in_dim,), jnp.float32),
        "w2": 0.05 * jax.random.normal(ks[1], (in_dim, out_dim), jnp.float32),
        "b2": jnp.zeros((out_dim,), jnp.float32),
        "hyper_w": 0.05 * jax.random.normal(ks[2], (out_dim, C), jnp.float32),
    }

    # synthetic "VLM" last-layer hidden states and its ce loss (see TODO above)
    vlm_last_hidden = jax.random.normal(ks[3], (n_seq, S, in_dim), jnp.float32)
    vlm_ce_loss = jnp.float32(1.25)

    # synthetic SAM image embeddings, NCHW (SAM ViT-H encoder not implemented)
    image_embeddings = jax.random.normal(ks[4], (B_img, C, Hm, Wm), jnp.float32)

    # input_ids with two [SEG] tokens per sequence; one sequence per image
    rng = np.random.default_rng(0)
    input_ids = rng.integers(10, 100, size=(n_seq, S)).astype(np.int32)
    input_ids[:, 3] = seg_token_idx
    input_ids[:, 6] = seg_token_idx
    offset = np.array([0, 1, 2], dtype=np.int64)

    masks_list = [
        (jax.random.uniform(ks[5], (2, Hg, Wg)) > 0.5).astype(jnp.float32),
        (jax.random.uniform(ks[6], (2, Hg, Wg)) > 0.5).astype(jnp.float32),
    ]

    out = vlm_sam_seg_forward(
        params, image_embeddings, vlm_last_hidden, vlm_ce_loss,
        input_ids, offset, masks_list,
        seg_token_idx=seg_token_idx,
        ce_loss_weight=1.0, dice_loss_weight=0.5, bce_loss_weight=2.0,
    )
    jax.block_until_ready(out["loss"])
    print("KERNEL_OK")
</pallas_src>

<mosaic_0001>
module attributes {stable_mosaic.version = 11 : i64} {
  func.func @_seg_mlp_hyper_kernel(%arg0: i32, %arg1: memref<8x128xbf16, #tpu.memory_space<vmem>>, %arg2: memref<128x128xbf16, #tpu.memory_space<vmem>>, %arg3: memref<1x128xf32, #tpu.memory_space<vmem>>, %arg4: memref<128x128xbf16, #tpu.memory_space<vmem>>, %arg5: memref<1x128xf32, #tpu.memory_space<vmem>>, %arg6: memref<128x128xbf16, #tpu.memory_space<vmem>>, %arg7: memref<8x128xbf16, #tpu.memory_space<vmem>>, %arg8: memref<8x128xf32, #tpu.memory_space<vmem>>) attributes {dimension_semantics = [#tpu.dimension_semantics<arbitrary>], iteration_bounds = array<i64: 1>, scalar_prefetch = 0 : i64, scratch_operands = 1 : i64, tpu.core_type = #tpu.core_type<tc>, window_params = [{pipeline_mode = #tpu.pipeline_mode<synchronous>, transform_indices = @transform_0, window_bounds = array<i64: 8, 128>}, {transform_indices = @transform_1, window_bounds = array<i64: 128, 128>}, {transform_indices = @transform_2, window_bounds = array<i64: 1, 128>}, {transform_indices = @transform_3, window_bounds = array<i64: 128, 128>}, {pipeline_mode = #tpu.pipeline_mode<synchronous>, transform_indices = @transform_4, window_bounds = array<i64: 1, 128>}, {pipeline_mode = #tpu.pipeline_mode<synchronous>, transform_indices = @transform_5, window_bounds = array<i64: 128, 128>}, {pipeline_mode = #tpu.pipeline_mode<synchronous>, transform_indices = @transform_6, window_bounds = array<i64: 8, 128>}]} {
    %c0_i32 = arith.constant 0 : i32
    %0 = arith.cmpi eq, %arg0, %c0_i32 : i32
    %1 = arith.extui %0 : i1 to i32
    %c0_i32_0 = arith.constant 0 : i32
    %2 = arith.cmpi ne, %1, %c0_i32_0 : i32
    scf.if %2 {
      %cst_16 = arith.constant 0.000000e+00 : f32
      %20 = vector.broadcast %cst_16 : f32 to vector<8x128xf32>
      %c0_17 = arith.constant 0 : index
      %c0_18 = arith.constant 0 : index
      %21 = vector.load %arg8[%c0_17, %c0_18] : memref<8x128xf32, #tpu.memory_space<vmem>>, vector<8x128xf32>
      tpu.vector_store %arg8[%c0_17, %c0_18], %20 {strides = array<i32>} : memref<8x128xf32, #tpu.memory_space<vmem>>, vector<8x128xf32>,
    } else {
    }
    %c0 = arith.constant 0 : index
    %c0_1 = arith.constant 0 : index
    %3 = vector.load %arg1[%c0, %c0_1] : memref<8x128xbf16, #tpu.memory_space<vmem>>, vector<8x128xbf16>
    %c0_2 = arith.constant 0 : index
    %c0_3 = arith.constant 0 : index
    %4 = vector.load %arg2[%c0_2, %c0_3] : memref<128x128xbf16, #tpu.memory_space<vmem>>, vector<128x128xbf16>
    %cst = arith.constant dense<0.000000e+00> : vector<8x128xf32>
    %5 = tpu.matmul %3, %4, %cst {dimension_numbers = #tpu.dot_dimension_numbers<[1], [0], [0], [1], [0, 0, 1, 1], [], []>} : vector<8x128xbf16>, vector<128x128xbf16>, vector<8x128xf32> -> vector<8x128xf32>
    %c0_4 = arith.constant 0 : index
    %c0_5 = arith.constant 0 : index
    %6 = vector.load %arg3[%c0_4, %c0_5] : memref<1x128xf32, #tpu.memory_space<vmem>>, vector<1x128xf32>
    %7 = vector.broadcast %6 : vector<1x128xf32> to vector<8x128xf32>
    %8 = arith.addf %5, %7 : vector<8x128xf32>
    %cst_6 = arith.constant 0.000000e+00 : f32
    %9 = vector.broadcast %cst_6 : f32 to vector<8x128xf32>
    %10 = arith.maximumf %8, %9 : vector<8x128xf32>
    %c0_7 = arith.constant 0 : index
    %c0_8 = arith.constant 0 : index
    %11 = vector.load %arg8[%c0_7, %c0_8] : memref<8x128xf32, #tpu.memory_space<vmem>>, vector<8x128xf32>
    %12 = arith.truncf %10 : vector<8x128xf32> to vector<8x128xbf16>
    %c0_9 = arith.constant 0 : index
    %c0_10 = arith.constant 0 : index
    %13 = vector.load %arg4[%c0_9, %c0_10] : memref<128x128xbf16, #tpu.memory_space<vmem>>, vector<128x128xbf16>
    %cst_11 = arith.constant dense<0.000000e+00> : vector<8x128xf32>
    %14 = tpu.matmul %12, %13, %cst_11 {dimension_numbers = #tpu.dot_dimension_numbers<[1], [0], [0], [1], [0, 0, 1, 1], [], []>} : vector<8x128xbf16>, vector<128x128xbf16>, vector<8x128xf32> -> vector<8x128xf32>
    %15 = arith.addf %11, %14 : vector<8x128xf32>
    %c0_12 = arith.constant 0 : index
    %c0_13 = arith.constant 0 : index
    %16 = vector.load %arg8[%c0_12, %c0_13] : memref<8x128xf32, #tpu.memory_space<vmem>>, vector<8x128xf32>
    tpu.vector_store %arg8[%c0_12, %c0_13], %15 {strides = array<i32>} : memref<8x128xf32, #tpu.memory_space<vmem>>, vector<8x128xf32>,
    %c0_i32_14 = arith.constant 0 : i32
    %17 = arith.cmpi eq, %arg0, %c0_i32_14 : i32
    %18 = arith.extui %17 : i1 to i32
    %c0_i32_15 = arith.constant 0 : i32
    %19 = arith.cmpi ne, %18, %c0_i32_15 : i32
    scf.if %19 {
      %c0_16 = arith.constant 0 : index
      %c0_17 = arith.constant 0 : index
      %20 = vector.load %arg8[%c0_16, %c0_17] : memref<8x128xf32, #tpu.memory_space<vmem>>, vector<8x128xf32>
      %c0_18 = arith.constant 0 : index
      %c0_19 = arith.constant 0 : index
      %21 = vector.load %arg5[%c0_18, %c0_19] : memref<1x128xf32, #tpu.memory_space<vmem>>, vector<1x128xf32>
      %22 = vector.broadcast %21 : vector<1x128xf32> to vector<8x128xf32>
      %23 = arith.addf %20, %22 : vector<8x128xf32>
      %24 = arith.truncf %23 : vector<8x128xf32> to vector<8x128xbf16>
      %c0_20 = arith.constant 0 : index
      %c0_21 = arith.constant 0 : index
      %25 = vector.load %arg6[%c0_20, %c0_21] : memref<128x128xbf16, #tpu.memory_space<vmem>>, vector<128x128xbf16>
      %cst_22 = arith.constant dense<0.000000e+00> : vector<8x128xf32>
      %26 = tpu.matmul %24, %25, %cst_22 {dimension_numbers = #tpu.dot_dimension_numbers<[1], [0], [0], [1], [0, 0, 1, 1], [], []>} : vector<8x128xbf16>, vector<128x128xbf16>, vector<8x128xf32> -> vector<8x128xf32>
      %27 = arith.truncf %26 : vector<8x128xf32> to vector<8x128xbf16>
      %c0_23 = arith.constant 0 : index
      %c0_24 = arith.constant 0 : index
      %28 = vector.load %arg7[%c0_23, %c0_24] : memref<8x128xbf16, #tpu.memory_space<vmem>>, vector<8x128xbf16>
      tpu.vector_store %arg7[%c0_23, %c0_24], %27 {strides = array<i32>} : memref<8x128xbf16, #tpu.memory_space<vmem>>, vector<8x128xbf16>,
    } else {
    }
    return
  }
  func.func @transform_0(%arg0: i32) -> (i32, i32) {
    %c0_i32 = arith.constant 0 : i32
    %c0_i32_0 = arith.constant 0 : i32
    %c0_i32_1 = arith.constant 0 : i32
    return %c0_i32, %c0_i32_0 : i32, i32
  }
  func.func @transform_1(%arg0: i32) -> (i32, i32) {
    %c0_i32 = arith.constant 0 : i32
    %c0_i32_0 = arith.constant 0 : i32
    return %c0_i32, %arg0 : i32, i32
  }
  func.func @transform_2(%arg0: i32) -> (i32, i32) {
    %c0_i32 = arith.constant 0 : i32
    %c0_i32_0 = arith.constant 0 : i32
    return %c0_i32, %arg0 : i32, i32
  }
  func.func @transform_3(%arg0: i32) -> (i32, i32) {
    %c0_i32 = arith.constant 0 : i32
    %c0_i32_0 = arith.constant 0 : i32
    return %arg0, %c0_i32 : i32, i32
  }
  func.func @transform_4(%arg0: i32) -> (i32, i32) {
    %c0_i32 = arith.constant 0 : i32
    %c0_i32_0 = arith.constant 0 : i32
    %c0_i32_1 = arith.constant 0 : i32
    return %c0_i32, %c0_i32_0 : i32, i32
  }
  func.func @transform_5(%arg0: i32) -> (i32, i32) {
    %c0_i32 = arith.constant 0 : i32
    %c0_i32_0 = arith.constant 0 : i32
    %c0_i32_1 = arith.constant 0 : i32
    return %c0_i32, %c0_i32_0 : i32, i32
  }
  func.func @transform_6(%arg0: i32) -> (i32, i32) {
    %c0_i32 = arith.constant 0 : i32
    %c0_i32_0 = arith.constant 0 : i32
    %c0_i32_1 = arith.constant 0 : i32
    return %c0_i32, %c0_i32_0 : i32, i32
  }
}

</mosaic_0001>

<bundles_post_ra>
// kernel: tpu_custom_call.1
= control target key start
LH: loop header
LB: loop body
LE: loop exit
PB: predicated region body
PF: predicated region fallthrough
CT: control target
= control target key end

     0   :  { %11 = vsyncpa [#allocation4], 0  ;;  %s682_s0 = inlined_call_operand.hbm [shape: bf16[8,128], index: 0, kind: input, shape index: {}]   ;;  %s683_s1 = inlined_call_operand.hbm [shape: bf16[128,128], index: 1, kind: input, shape index: {}]   ;;  %s684_s2 = inlined_call_operand.vmem [shape: f32[1,128], index: 2, kind: input, shape index: {}]   ;;  %s685_s3 = inlined_call_operand.hbm [shape: bf16[128,128], index: 3, kind: input, shape index: {}]   ;;  %s686_s4 = inlined_call_operand.vmem [shape: f32[1,128], index: 4, kind: input, shape index: {}]   ;;  %s687_s5 = inlined_call_operand.hbm [shape: bf16[128,128], index: 5, kind: input, shape index: {}]   ;;  %s688_s6 = inlined_call_operand.hbm [shape: bf16[8,128], index: 6, kind: output, shape index: {}]  }
   0x1   :  { %12 = vsyncpa [#allocation7], 0 }
   0x2   :  { %13 = vsyncpa [#allocation10], 0  ;;  %s30_s23 = sshll.u32 %s683_s1, 4  ;;  %s31_s23 = int_to_ptr.hbm [resolvable:$true] %s30_s23 }
   0x3   :  { %14 = vsyncpa [#allocation5], 0  ;;  %s619_s24 = smov [#allocation6]   ;;  %s20_s28 = sshll.u32 %s682_s0, 4  ;;  %s21_s28 = int_to_ptr.hbm [resolvable:$true] %s20_s28 }
   0x4   :  { %s32_s25 = sshll.u32 %s619_s24, 4  ;;  %s620_s29 = smov 64   ;;  %s33_s25 = int_to_ptr.vmem [resolvable:$true] %s32_s25 }
   0x5   :  { %s621_s30 = smov 4   ;;  %s622_s7 = smov [#allocation3]  }
   0x6   :  { %38 = dma.hbm_to_vmem [thread:$0]  %s31_s23, 1024, %s33_s25, [#allocation7], %s620_s29, %s620_s29, %s621_s30  }
   0x7   :  { %s22_s8 = sshll.u32 %s622_s7, 4  ;;  %s45_s11 = sshll.u32 %s685_s3, 4  ;;  %s23_s8 = int_to_ptr.vmem [resolvable:$true] %s22_s8  ;;  %s46_s11 = int_to_ptr.hbm [resolvable:$true] %s45_s11 }
   0x8   :  { %25 = dma.hbm_to_vmem [thread:$0]  %s21_s28, 64, %s23_s8, [#allocation4]  }
   0x9   :  { %s60_s13 = sshll.u32 %s687_s5, 4  ;;  %s623_s14 = smov [#allocation8]   ;;  %s61_s13 = int_to_ptr.hbm [resolvable:$true] %s60_s13 }
   0xa   :  { %s47_s15 = sshll.u32 %s623_s14, 4  ;;  %s624_s0 = smov [#allocation9]   ;;  %s48_s15 = int_to_ptr.vmem [resolvable:$true] %s47_s15 }
   0xb   :  { %53 = dma.hbm_to_vmem [thread:$0]  %s46_s11, 1024, %s48_s15, [#allocation7], %s620_s29, %s620_s29, %s621_s30  }
   0xc   :  { %s62_s16 = sshll.u32 %s624_s0, 4  ;;  %s63_s16 = int_to_ptr.vmem [resolvable:$true] %s62_s16 }
   0xd   :  { %68 = dma.hbm_to_vmem [thread:$0]  %s61_s13, 1024, %s63_s16, [#allocation10], %s620_s29, %s620_s29, %s621_s30  }
   0xe   :  { %611 = dma.done.wait [#allocation4], 64  }
   0xf   :  { %612 = vsyncadd [#allocation4], 4294967232 }
  0x10   :  { %613 = dma.done.wait [#allocation7], 2048  }
  0x11   :  { %614 = vsyncadd [#allocation7], 4294965248 }
  0x12   :  { %615 = dma.done.wait [#allocation10], 1024  }
  0x13   :  { %616 = vsyncadd [#allocation10], 4294966272  ;;  %v465_v0 = vld [vmem:[#allocation6 + $0x38] sm:$0xff]  ;;  %v464_v1 = vld [vmem:[#allocation6 + $0x30] sm:$0xff]  ;;  %s350_s22 = sshll.u32 %s688_s6, 4  ;;  %s351_s22 = int_to_ptr.hbm [resolvable:$true] %s350_s22 }
  0x14   :  { %159 = vmatpush.bf16.msra.mxu0 %v465_v0  ;;  %v473_v2 = vld [vmem:[#allocation8 + $0x38] sm:$0xff]  ;;  %v472_v3 = vld [vmem:[#allocation8 + $0x30] sm:$0xff]  ;;  %v463_v4 = vld [vmem:[#allocation6 + $0x28] sm:$0xff] }
  0x15   :  { %239 = vmatpush.bf16.msra.mxu1 %v473_v2  ;;  %v471_v5 = vld [vmem:[#allocation8 + $0x28] sm:$0xff]  ;;  %v462_v6 = vld [vmem:[#allocation6 + $0x20] sm:$0xff]  ;;  %v461_v8 = vld [vmem:[#allocation6 + $0x18] sm:$0xff] }
  0x16   :  { %v470_v7 = vld [vmem:[#allocation8 + $0x20] sm:$0xff]  ;;  %v469_v9 = vld [vmem:[#allocation8 + $0x18] sm:$0xff]  ;;  %v460_v10 = vld [vmem:[#allocation6 + $0x10] sm:$0xff] }
  0x17   :  { %v468_v11 = vld [vmem:[#allocation8 + $0x10] sm:$0xff]  ;;  %v459_v12 = vld [vmem:[#allocation6 + $0x8] sm:$0xff]  ;;  %v458_v13 = vld [vmem:[#allocation6] sm:$0xff] }
  0x18   :  { %160 = vmatpush.bf16.msra.mxu0 %v464_v1  ;;  %v90_v14 = vld [vmem:[#allocation3] sm:$0xf]  ;;  %v467_v15 = vld [vmem:[#allocation8 + $0x8] sm:$0xff]  ;;  %v466_v16 = vld [vmem:[#allocation8] sm:$0xff] }
  0x19   :  { %240 = vmatpush.bf16.msra.mxu1 %v472_v3  ;;  %v481_v17 = vld [vmem:[#allocation9 + $0x38] sm:$0xff]  ;;  %v480_v18 = vld [vmem:[#allocation9 + $0x30] sm:$0xff]  ;;  %v479_v19 = vld [vmem:[#allocation9 + $0x28] sm:$0xff] }
  0x1a   :  { %328 = vmatpush.bf16.msra.mxu2 %v481_v17  ;;  %v478_v20 = vld [vmem:[#allocation9 + $0x20] sm:$0xff]  ;;  %v477_v21 = vld [vmem:[#allocation9 + $0x18] sm:$0xff]  ;;  %v476_v22 = vld [vmem:[#allocation9 + $0x10] sm:$0xff] }
  0x1b   :  { %v489_v23 = vld [vmem:[%s684_s2] ss:$0 sm:$0xff]  ;;  %v475_v24 = vld [vmem:[#allocation9 + $0x8] sm:$0xff]  ;;  %v474_v30 = vld [vmem:[#allocation9] sm:$0xff]  ;;  %s625_s2 = smov [#allocation11]  }
  0x1c   :  { %161 = vmatpush.bf16.msra.mxu0 %v463_v4  ;;  %v490_v31 = vld [vmem:[%s686_s4] ss:$0 sm:$0xff]  ;;  %s348_s19 = sshll.u32 %s625_s2, 4  ;;  %s349_s19 = int_to_ptr.vmem [resolvable:$true] %s348_s19 }
  0x1d   :  { %241 = vmatpush.bf16.msra.mxu1 %v471_v5 }
  0x1e   :  { %329 = vmatpush.bf16.msra.mxu2 %v480_v18 }
  0x20   :  { %162 = vmatpush.bf16.msra.mxu0 %v462_v6 }
  0x21   :  { %242 = vmatpush.bf16.msra.mxu1 %v470_v7 }
  0x22   :  { %330 = vmatpush.bf16.msra.mxu2 %v479_v19 }
  0x24   :  { %163 = vmatpush.bf16.msra.mxu0 %v461_v8 }
  0x25   :  { %243 = vmatpush.bf16.msra.mxu1 %v469_v9 }
  0x26   :  { %331 = vmatpush.bf16.msra.mxu2 %v478_v20 }
  0x28   :  { %164 = vmatpush.bf16.msra.mxu0 %v460_v10 }
  0x29   :  { %244 = vmatpush.bf16.msra.mxu1 %v468_v11 }
  0x2a   :  { %332 = vmatpush.bf16.msra.mxu2 %v477_v21 }
  0x2c   :  { %165 = vmatpush.bf16.msra.mxu0 %v459_v12 }
  0x2d   :  { %245 = vmatpush.bf16.msra.mxu1 %v467_v15 }
  0x2e   :  { %333 = vmatpush.bf16.msra.mxu2 %v476_v22 }
  0x30   :  { %166 = vmatpush.bf16.msra.mxu0 %v458_v13 }
  0x31   :  { %246 = vmatpush.bf16.msra.mxu1 %v466_v16 }
  0x32   :  { %334 = vmatpush.bf16.msra.mxu2 %v475_v24 }
  0x33   :  { %167 = vmatmul.bf16.vlgmr.msra.gmra.mxu0 %v90_v14 }
  0x36   :  { %335 = vmatpush.bf16.msra.mxu2 %v474_v30 }
  0xb0   :  { %v168_v25 = vpop.f32.mrf.mxu0 }
  0xb1   :  { %v169_v26 = vadd.f32 %v489_v23, %v168_v25 }
  0xb3   :  { %v172_v27 = vmax.f32 %v169_v26, 0.0 }
  0xb5   :  { %v174_v28 = vpack.c.bf16 %v172_v27, %v172_v27 }
  0xb7   :  { %247 = vmatmul.bf16.vlgmr.msra.gmra.mxu1 %v174_v28 }
  0xb8   :  { %v170_v29 = vpop.f32.mrf.mxu0 }
 0x134   :  { %v248_v32 = vpop.f32.mrf.mxu1 }
 0x135   :  { %v262_v33 = vadd.f32 %v490_v31, %v248_v32 }
 0x137   :  { %v263_v34 = vpack.c.bf16 %v262_v33, %v262_v33 }
 0x139   :  { %336 = vmatmul.bf16.vlgmr.msra.gmra.mxu2 %v263_v34 }
 0x13c   :  { %v250_v35 = vpop.f32.mrf.mxu1 }
 0x1bc   :  { %v337_v36 = vpop.f32.mrf.mxu2 }
 0x1bd   :  { %v341_v37 = vpack.c.bf16 %v337_v36, %v337_v36 }
 0x1bf   :  { %342 = vst [vmem:[#allocation11] sm:$0xf] %v341_v37 }
 0x1c0   :  { %353 = dma.vmem_to_hbm [thread:$0]  %s349_s19, 64, %s351_s22, [#allocation5]  }
 0x1c4   :  { %v339_v38 = vpop.f32.mrf.mxu2 }
 0x1c5   :  { %617 = dma.done.wait [#allocation5], 64  }
 0x1c6   :  { %618 = vsyncadd [#allocation5], 4294967232 }
 0x1c7   :  { %358 = vsyncpa [#allocation4], 1 }
 0x1c8   :  { %359 = vsyncpa [#allocation7], 1 }
 0x1c9   :  { %360 = vsyncpa [#allocation10], 1 }
 0x1ca   :  { %361 = vsyncpa [#allocation5], 1 }

</bundles_post_ra>
